<compile_context>
chip_gen: v7x
topology: tpu7x:2x2x1
jax: 0.10.0
libtpu: 0.0.40
codegen_flags: <defaults>
</compile_context>

<pallas_src>
import functools

import jax
import jax.numpy as jnp
from jax.experimental import pallas as pl
from jax.experimental.pallas import tpu as pltpu


# ----------------------------------------------------------------------------
# Pallas kernels
# ----------------------------------------------------------------------------
def _conv3x3_bias_kernel(x_ref, w_ref, b_ref, o_ref, *, H, W, Cin, Cout):
    """3x3 / stride-1 / pad-1 conv + bias for one batch element.

    x_ref: (1, H+2, W+2, Cin)  f32  spatially pre-padded NHWC input block (VMEM)
    w_ref: (3, 3, Cin, Cout)   bf16 packed weights
    b_ref: (1, Cout)           f32
    o_ref: (1, H*W, Cout)      f32
    """
    acc = jnp.zeros((H * W, Cout), jnp.float32)
    for i in range(3):                                  # 9 shifted matmuls, fused
        for j in range(3):
            # Static ref slice straight out of VMEM; the (H, W, Cin)->(H*W, Cin)
            # reshape only merges leading dims into sublanes (layout-cheap).
            xs = x_ref[0, i:i + H, j:j + W, :].reshape(H * W, Cin)
            acc = acc + jnp.dot(xs.astype(jnp.bfloat16), w_ref[i, j],
                                preferred_element_type=jnp.float32)
    o_ref[0, :, :] = acc + b_ref[...]                   # fused bias epilogue


def _bn_lrelu_kernel(y_ref, gamma_ref, beta_ref, o_ref, *, eps, slope):
    """Fused training-mode BatchNorm (per-channel batch stats) + LeakyReLU.

    y_ref:  (B, tc, H*W) f32  channel-major conv output (spatial dim on lanes)
    gamma_ref, beta_ref: (tc, 1) f32
    o_ref:  (B, tc, H*W) f32
    """
    # TODO(synk): nn.BatchNorm2d also updates running_mean/running_var buffers as
    # a training side effect; only the forward output is produced here.
    y = y_ref[...]
    n = y.shape[0] * y.shape[2]
    s = jnp.sum(y, axis=0, keepdims=True)                       # over batch (cheap)
    mean = jnp.sum(s, axis=2, keepdims=True) * (1.0 / n)        # lane reduce
    centered = y - mean
    c2 = jnp.sum(centered * centered, axis=0, keepdims=True)
    var = jnp.sum(c2, axis=2, keepdims=True) * (1.0 / n)
    scale = gamma_ref[...][None] * jax.lax.rsqrt(var + eps)     # (1, tc, 1)
    out = centered * scale + beta_ref[...][None]
    o_ref[...] = jnp.where(out > 0, out, slope * out)


# ----------------------------------------------------------------------------
# Wrappers
# ----------------------------------------------------------------------------
def prepare_params(w_oihw, bias, gamma, beta):
    """Hoist weight packing / casts out of the per-forward hot path."""
    # torch Conv2d weight layout (Cout, Cin, kH, kW) -> (kH, kW, Cin, Cout), bf16
    w_packed = jnp.transpose(w_oihw, (2, 3, 1, 0)).astype(jnp.bfloat16)
    return {
        "w": w_packed,
        "b": bias.reshape(1, -1).astype(jnp.float32),
        "gamma": gamma.reshape(-1, 1).astype(jnp.float32),
        "beta": beta.reshape(-1, 1).astype(jnp.float32),
    }


def _bn_channel_tile(B, Cout, HW, bytes_budget=4 << 20):
    """Largest channel tile whose block stays legal ((tc, HW) divisible by (8, 128))
    and within a modest VMEM budget; falls back to one full block."""
    if Cout % 8 != 0 or HW % 128 != 0:
        return Cout                       # full-extent block is always legal
    tc = Cout
    while tc > 8 and B * tc * HW * 4 > bytes_budget and (tc // 2) % 8 == 0:
        tc //= 2
    return tc


def vgg_layer_forward(params, x_nchw, *, eps=1e-5, slope=0.2):
    w, b = params["w"], params["b"]
    gamma, beta = params["gamma"], params["beta"]
    B, Cin, H, W = x_nchw.shape
    Cout = w.shape[-1]
    HW = H * W

    # NCHW -> NHWC (+1 halo) for the conv input; one cheap pass over the input.
    x = jnp.transpose(x_nchw, (0, 2, 3, 1))
    xp = jnp.pad(x, ((0, 0), (1, 1), (1, 1), (0, 0)))

    conv = pl.pallas_call(
        functools.partial(_conv3x3_bias_kernel, H=H, W=W, Cin=Cin, Cout=Cout),
        out_shape=jax.ShapeDtypeStruct((B, HW, Cout), jnp.float32),
        grid_spec=pltpu.PrefetchScalarGridSpec(
            num_scalar_prefetch=0,
            grid=(B,),
            in_specs=[
                pl.BlockSpec((1, H + 2, W + 2, Cin), lambda bb: (bb, 0, 0, 0)),
                pl.BlockSpec((3, 3, Cin, Cout), lambda bb: (0, 0, 0, 0)),
                pl.BlockSpec((1, Cout), lambda bb: (0, 0)),
            ],
            out_specs=pl.BlockSpec((1, HW, Cout), lambda bb: (bb, 0, 0)),
        ),
        compiler_params=pltpu.CompilerParams(
            dimension_semantics=("parallel",)),
    )(xp, w, b)

    # Single layout pass (replaces the previous *trailing* NHWC->NCHW transpose):
    # channel-major so BN is lane-dense and the final NCHW reshape is free.
    y = jnp.transpose(conv, (0, 2, 1))                   # (B, Cout, H*W)

    tc = _bn_channel_tile(B, Cout, HW)
    out = pl.pallas_call(
        functools.partial(_bn_lrelu_kernel, eps=eps, slope=slope),
        out_shape=jax.ShapeDtypeStruct((B, Cout, HW), jnp.float32),
        grid_spec=pltpu.PrefetchScalarGridSpec(
            num_scalar_prefetch=0,
            grid=(Cout // tc,),
            in_specs=[
                pl.BlockSpec((B, tc, HW), lambda c: (0, c, 0)),
                pl.BlockSpec((tc, 1), lambda c: (c, 0)),
                pl.BlockSpec((tc, 1), lambda c: (c, 0)),
            ],
            out_specs=pl.BlockSpec((B, tc, HW), lambda c: (0, c, 0)),
        ),
        compiler_params=pltpu.CompilerParams(
            dimension_semantics=("parallel",)),
    )(y, gamma, beta)

    return out.reshape(B, Cout, H, W)                    # free reshape, NCHW out


# ----------------------------------------------------------------------------
# Pure-JAX reference (for tolerance check)
# ----------------------------------------------------------------------------
def _reference(x_nchw, w_oihw, bias, gamma, beta, eps=1e-5, slope=0.2):
    y = jax.lax.conv_general_dilated(
        x_nchw, w_oihw, window_strides=(1, 1), padding=((1, 1), (1, 1)),
        dimension_numbers=("NCHW", "OIHW", "NCHW"))
    y = y + bias[None, :, None, None]
    mean = jnp.mean(y, axis=(0, 2, 3), keepdims=True)
    var = jnp.mean((y - mean) ** 2, axis=(0, 2, 3), keepdims=True)
    yn = (y - mean) * jax.lax.rsqrt(var + eps)
    yn = yn * gamma[None, :, None, None] + beta[None, :, None, None]
    return jnp.where(yn > 0, yn, slope * yn)


# ----------------------------------------------------------------------------
if __name__ == "__main__":
    B, Cin, H, W, Cout = 2, 4, 16, 16, 8
    key = jax.random.PRNGKey(0)
    kx, kw, kb, kg, kbt = jax.random.split(key, 5)

    x = jax.random.normal(kx, (B, Cin, H, W), jnp.float32)
    w_oihw = jax.random.normal(kw, (Cout, Cin, 3, 3), jnp.float32) / jnp.sqrt(
        jnp.float32(9 * Cin))
    bias = 0.1 * jax.random.normal(kb, (Cout,), jnp.float32)
    gamma = 1.0 + 0.1 * jax.random.normal(kg, (Cout,), jnp.float32)
    beta = 0.1 * jax.random.normal(kbt, (Cout,), jnp.float32)

    params = prepare_params(w_oihw, bias, gamma, beta)

    out = jax.jit(vgg_layer_forward)(params, x)
    jax.block_until_ready(out)

    assert out.shape == (B, Cout, H, W), out.shape
    assert bool(jnp.all(jnp.isfinite(out)))

    ref = _reference(x, w_oihw, bias, gamma, beta)
    assert bool(jnp.allclose(out, ref, atol=5e-2, rtol=5e-2)), float(
        jnp.max(jnp.abs(out - ref)))

    print("KERNEL_OK")
</pallas_src>

<mosaic_0001>
module attributes {stable_mosaic.version = 11 : i64} {
  func.func @_conv3x3_bias_kernel(%arg0: i32, %arg1: memref<1x18x18x4xf32, #tpu.memory_space<vmem>>, %arg2: memref<3x3x4x8xbf16, #tpu.memory_space<vmem>>, %arg3: memref<1x8xf32, #tpu.memory_space<vmem>>, %arg4: memref<1x256x8xf32, #tpu.memory_space<vmem>>) attributes {dimension_semantics = [#tpu.dimension_semantics<parallel>], iteration_bounds = array<i64: 2>, scalar_prefetch = 0 : i64, scratch_operands = 0 : i64, tpu.core_type = #tpu.core_type<tc>, window_params = [{transform_indices = @transform_0, window_bounds = array<i64: 1, 18, 18, 4>}, {pipeline_mode = #tpu.pipeline_mode<synchronous>, transform_indices = @transform_1, window_bounds = array<i64: 3, 3, 4, 8>}, {pipeline_mode = #tpu.pipeline_mode<synchronous>, transform_indices = @transform_2, window_bounds = array<i64: 1, 8>}, {transform_indices = @transform_3, window_bounds = array<i64: 1, 256, 8>}]} {
    %cst = arith.constant 0.000000e+00 : f32
    %0 = vector.broadcast %cst : f32 to vector<256x8xf32>
    %c0 = arith.constant 0 : index
    %c0_0 = arith.constant 0 : index
    %c0_1 = arith.constant 0 : index
    %c0_2 = arith.constant 0 : index
    %1 = vector.load %arg1[%c0, %c0_0, %c0_1, %c0_2] : memref<1x18x18x4xf32, #tpu.memory_space<vmem>>, vector<1x16x16x4xf32>
    %2 = vector.shape_cast %1 : vector<1x16x16x4xf32> to vector<16x16x4xf32>
    %3 = vector.shape_cast %2 : vector<16x16x4xf32> to vector<256x4xf32>
    %4 = arith.truncf %3 : vector<256x4xf32> to vector<256x4xbf16>
    %c0_3 = arith.constant 0 : index
    %c0_4 = arith.constant 0 : index
    %c0_5 = arith.constant 0 : index
    %c0_6 = arith.constant 0 : index
    %5 = vector.load %arg2[%c0_3, %c0_4, %c0_5, %c0_6] : memref<3x3x4x8xbf16, #tpu.memory_space<vmem>>, vector<1x1x4x8xbf16>
    %6 = vector.shape_cast %5 : vector<1x1x4x8xbf16> to vector<4x8xbf16>
    %cst_7 = arith.constant dense<0.000000e+00> : vector<256x8xf32>
    %7 = tpu.matmul %4, %6, %cst_7 {dimension_numbers = #tpu.dot_dimension_numbers<[1], [0], [0], [1], [0, 0, 1, 1], [], []>} : vector<256x4xbf16>, vector<4x8xbf16>, vector<256x8xf32> -> vector<256x8xf32>
    %8 = arith.addf %0, %7 : vector<256x8xf32>
    %c0_8 = arith.constant 0 : index
    %c0_9 = arith.constant 0 : index
    %c1 = arith.constant 1 : index
    %c0_10 = arith.constant 0 : index
    %9 = vector.load %arg1[%c0_8, %c0_9, %c1, %c0_10] : memref<1x18x18x4xf32, #tpu.memory_space<vmem>>, vector<1x16x16x4xf32>
    %10 = vector.shape_cast %9 : vector<1x16x16x4xf32> to vector<16x16x4xf32>
    %11 = vector.shape_cast %10 : vector<16x16x4xf32> to vector<256x4xf32>
    %12 = arith.truncf %11 : vector<256x4xf32> to vector<256x4xbf16>
    %c0_11 = arith.constant 0 : index
    %c1_12 = arith.constant 1 : index
    %c0_13 = arith.constant 0 : index
    %c0_14 = arith.constant 0 : index
    %13 = vector.load %arg2[%c0_11, %c1_12, %c0_13, %c0_14] : memref<3x3x4x8xbf16, #tpu.memory_space<vmem>>, vector<1x1x4x8xbf16>
    %14 = vector.shape_cast %13 : vector<1x1x4x8xbf16> to vector<4x8xbf16>
    %cst_15 = arith.constant dense<0.000000e+00> : vector<256x8xf32>
    %15 = tpu.matmul %12, %14, %cst_15 {dimension_numbers = #tpu.dot_dimension_numbers<[1], [0], [0], [1], [0, 0, 1, 1], [], []>} : vector<256x4xbf16>, vector<4x8xbf16>, vector<256x8xf32> -> vector<256x8xf32>
    %16 = arith.addf %8, %15 : vector<256x8xf32>
    %c0_16 = arith.constant 0 : index
    %c0_17 = arith.constant 0 : index
    %c2 = arith.constant 2 : index
    %c0_18 = arith.constant 0 : index
    %17 = vector.load %arg1[%c0_16, %c0_17, %c2, %c0_18] : memref<1x18x18x4xf32, #tpu.memory_space<vmem>>, vector<1x16x16x4xf32>
    %18 = vector.shape_cast %17 : vector<1x16x16x4xf32> to vector<16x16x4xf32>
    %19 = vector.shape_cast %18 : vector<16x16x4xf32> to vector<256x4xf32>
    %20 = arith.truncf %19 : vector<256x4xf32> to vector<256x4xbf16>
    %c0_19 = arith.constant 0 : index
    %c2_20 = arith.constant 2 : index
    %c0_21 = arith.constant 0 : index
    %c0_22 = arith.constant 0 : index
    %21 = vector.load %arg2[%c0_19, %c2_20, %c0_21, %c0_22] : memref<3x3x4x8xbf16, #tpu.memory_space<vmem>>, vector<1x1x4x8xbf16>
    %22 = vector.shape_cast %21 : vector<1x1x4x8xbf16> to vector<4x8xbf16>
    %cst_23 = arith.constant dense<0.000000e+00> : vector<256x8xf32>
    %23 = tpu.matmul %20, %22, %cst_23 {dimension_numbers = #tpu.dot_dimension_numbers<[1], [0], [0], [1], [0, 0, 1, 1], [], []>} : vector<256x4xbf16>, vector<4x8xbf16>, vector<256x8xf32> -> vector<256x8xf32>
    %24 = arith.addf %16, %23 : vector<256x8xf32>
    %c0_24 = arith.constant 0 : index
    %c1_25 = arith.constant 1 : index
    %c0_26 = arith.constant 0 : index
    %c0_27 = arith.constant 0 : index
    %25 = vector.load %arg1[%c0_24, %c1_25, %c0_26, %c0_27] : memref<1x18x18x4xf32, #tpu.memory_space<vmem>>, vector<1x16x16x4xf32>
    %26 = vector.shape_cast %25 : vector<1x16x16x4xf32> to vector<16x16x4xf32>
    %27 = vector.shape_cast %26 : vector<16x16x4xf32> to vector<256x4xf32>
    %28 = arith.truncf %27 : vector<256x4xf32> to vector<256x4xbf16>
    %c1_28 = arith.constant 1 : index
    %c0_29 = arith.constant 0 : index
    %c0_30 = arith.constant 0 : index
    %c0_31 = arith.constant 0 : index
    %29 = vector.load %arg2[%c1_28, %c0_29, %c0_30, %c0_31] : memref<3x3x4x8xbf16, #tpu.memory_space<vmem>>, vector<1x1x4x8xbf16>
    %30 = vector.shape_cast %29 : vector<1x1x4x8xbf16> to vector<4x8xbf16>
    %cst_32 = arith.constant dense<0.000000e+00> : vector<256x8xf32>
    %31 = tpu.matmul %28, %30, %cst_32 {dimension_numbers = #tpu.dot_dimension_numbers<[1], [0], [0], [1], [0, 0, 1, 1], [], []>} : vector<256x4xbf16>, vector<4x8xbf16>, vector<256x8xf32> -> vector<256x8xf32>
    %32 = arith.addf %24, %31 : vector<256x8xf32>
    %c0_33 = arith.constant 0 : index
    %c1_34 = arith.constant 1 : index
    %c1_35 = arith.constant 1 : index
    %c0_36 = arith.constant 0 : index
    %33 = vector.load %arg1[%c0_33, %c1_34, %c1_35, %c0_36] : memref<1x18x18x4xf32, #tpu.memory_space<vmem>>, vector<1x16x16x4xf32>
    %34 = vector.shape_cast %33 : vector<1x16x16x4xf32> to vector<16x16x4xf32>
    %35 = vector.shape_cast %34 : vector<16x16x4xf32> to vector<256x4xf32>
    %36 = arith.truncf %35 : vector<256x4xf32> to vector<256x4xbf16>
    %c1_37 = arith.constant 1 : index
    %c1_38 = arith.constant 1 : index
    %c0_39 = arith.constant 0 : index
    %c0_40 = arith.constant 0 : index
    %37 = vector.load %arg2[%c1_37, %c1_38, %c0_39, %c0_40] : memref<3x3x4x8xbf16, #tpu.memory_space<vmem>>, vector<1x1x4x8xbf16>
    %38 = vector.shape_cast %37 : vector<1x1x4x8xbf16> to vector<4x8xbf16>
    %cst_41 = arith.constant dense<0.000000e+00> : vector<256x8xf32>
    %39 = tpu.matmul %36, %38, %cst_41 {dimension_numbers = #tpu.dot_dimension_numbers<[1], [0], [0], [1], [0, 0, 1, 1], [], []>} : vector<256x4xbf16>, vector<4x8xbf16>, vector<256x8xf32> -> vector<256x8xf32>
    %40 = arith.addf %32, %39 : vector<256x8xf32>
    %c0_42 = arith.constant 0 : index
    %c1_43 = arith.constant 1 : index
    %c2_44 = arith.constant 2 : index
    %c0_45 = arith.constant 0 : index
    %41 = vector.load %arg1[%c0_42, %c1_43, %c2_44, %c0_45] : memref<1x18x18x4xf32, #tpu.memory_space<vmem>>, vector<1x16x16x4xf32>
    %42 = vector.shape_cast %41 : vector<1x16x16x4xf32> to vector<16x16x4xf32>
    %43 = vector.shape_cast %42 : vector<16x16x4xf32> to vector<256x4xf32>
    %44 = arith.truncf %43 : vector<256x4xf32> to vector<256x4xbf16>
    %c1_46 = arith.constant 1 : index
    %c2_47 = arith.constant 2 : index
    %c0_48 = arith.constant 0 : index
    %c0_49 = arith.constant 0 : index
    %45 = vector.load %arg2[%c1_46, %c2_47, %c0_48, %c0_49] : memref<3x3x4x8xbf16, #tpu.memory_space<vmem>>, vector<1x1x4x8xbf16>
    %46 = vector.shape_cast %45 : vector<1x1x4x8xbf16> to vector<4x8xbf16>
    %cst_50 = arith.constant dense<0.000000e+00> : vector<256x8xf32>
    %47 = tpu.matmul %44, %46, %cst_50 {dimension_numbers = #tpu.dot_dimension_numbers<[1], [0], [0], [1], [0, 0, 1, 1], [], []>} : vector<256x4xbf16>, vector<4x8xbf16>, vector<256x8xf32> -> vector<256x8xf32>
    %48 = arith.addf %40, %47 : vector<256x8xf32>
    %c0_51 = arith.constant 0 : index
    %c2_52 = arith.constant 2 : index
    %c0_53 = arith.constant 0 : index
    %c0_54 = arith.constant 0 : index
    %49 = vector.load %arg1[%c0_51, %c2_52, %c0_53, %c0_54] : memref<1x18x18x4xf32, #tpu.memory_space<vmem>>, vector<1x16x16x4xf32>
    %50 = vector.shape_cast %49 : vector<1x16x16x4xf32> to vector<16x16x4xf32>
    %51 = vector.shape_cast %50 : vector<16x16x4xf32> to vector<256x4xf32>
    %52 = arith.truncf %51 : vector<256x4xf32> to vector<256x4xbf16>
    %c2_55 = arith.constant 2 : index
    %c0_56 = arith.constant 0 : index
    %c0_57 = arith.constant 0 : index
    %c0_58 = arith.constant 0 : index
    %53 = vector.load %arg2[%c2_55, %c0_56, %c0_57, %c0_58] : memref<3x3x4x8xbf16, #tpu.memory_space<vmem>>, vector<1x1x4x8xbf16>
    %54 = vector.shape_cast %53 : vector<1x1x4x8xbf16> to vector<4x8xbf16>
    %cst_59 = arith.constant dense<0.000000e+00> : vector<256x8xf32>
    %55 = tpu.matmul %52, %54, %cst_59 {dimension_numbers = #tpu.dot_dimension_numbers<[1], [0], [0], [1], [0, 0, 1, 1], [], []>} : vector<256x4xbf16>, vector<4x8xbf16>, vector<256x8xf32> -> vector<256x8xf32>
    %56 = arith.addf %48, %55 : vector<256x8xf32>
    %c0_60 = arith.constant 0 : index
    %c2_61 = arith.constant 2 : index
    %c1_62 = arith.constant 1 : index
    %c0_63 = arith.constant 0 : index
    %57 = vector.load %arg1[%c0_60, %c2_61, %c1_62, %c0_63] : memref<1x18x18x4xf32, #tpu.memory_space<vmem>>, vector<1x16x16x4xf32>
    %58 = vector.shape_cast %57 : vector<1x16x16x4xf32> to vector<16x16x4xf32>
    %59 = vector.shape_cast %58 : vector<16x16x4xf32> to vector<256x4xf32>
    %60 = arith.truncf %59 : vector<256x4xf32> to vector<256x4xbf16>
    %c2_64 = arith.constant 2 : index
    %c1_65 = arith.constant 1 : index
    %c0_66 = arith.constant 0 : index
    %c0_67 = arith.constant 0 : index
    %61 = vector.load %arg2[%c2_64, %c1_65, %c0_66, %c0_67] : memref<3x3x4x8xbf16, #tpu.memory_space<vmem>>, vector<1x1x4x8xbf16>
    %62 = vector.shape_cast %61 : vector<1x1x4x8xbf16> to vector<4x8xbf16>
    %cst_68 = arith.constant dense<0.000000e+00> : vector<256x8xf32>
    %63 = tpu.matmul %60, %62, %cst_68 {dimension_numbers = #tpu.dot_dimension_numbers<[1], [0], [0], [1], [0, 0, 1, 1], [], []>} : vector<256x4xbf16>, vector<4x8xbf16>, vector<256x8xf32> -> vector<256x8xf32>
    %64 = arith.addf %56, %63 : vector<256x8xf32>
    %c0_69 = arith.constant 0 : index
    %c2_70 = arith.constant 2 : index
    %c2_71 = arith.constant 2 : index
    %c0_72 = arith.constant 0 : index
    %65 = vector.load %arg1[%c0_69, %c2_70, %c2_71, %c0_72] : memref<1x18x18x4xf32, #tpu.memory_space<vmem>>, vector<1x16x16x4xf32>
    %66 = vector.shape_cast %65 : vector<1x16x16x4xf32> to vector<16x16x4xf32>
    %67 = vector.shape_cast %66 : vector<16x16x4xf32> to vector<256x4xf32>
    %68 = arith.truncf %67 : vector<256x4xf32> to vector<256x4xbf16>
    %c2_73 = arith.constant 2 : index
    %c2_74 = arith.constant 2 : index
    %c0_75 = arith.constant 0 : index
    %c0_76 = arith.constant 0 : index
    %69 = vector.load %arg2[%c2_73, %c2_74, %c0_75, %c0_76] : memref<3x3x4x8xbf16, #tpu.memory_space<vmem>>, vector<1x1x4x8xbf16>
    %70 = vector.shape_cast %69 : vector<1x1x4x8xbf16> to vector<4x8xbf16>
    %cst_77 = arith.constant dense<0.000000e+00> : vector<256x8xf32>
    %71 = tpu.matmul %68, %70, %cst_77 {dimension_numbers = #tpu.dot_dimension_numbers<[1], [0], [0], [1], [0, 0, 1, 1], [], []>} : vector<256x4xbf16>, vector<4x8xbf16>, vector<256x8xf32> -> vector<256x8xf32>
    %72 = arith.addf %64, %71 : vector<256x8xf32>
    %c0_78 = arith.constant 0 : index
    %c0_79 = arith.constant 0 : index
    %73 = vector.load %arg3[%c0_78, %c0_79] : memref<1x8xf32, #tpu.memory_space<vmem>>, vector<1x8xf32>
    %74 = vector.broadcast %73 : vector<1x8xf32> to vector<256x8xf32>
    %75 = arith.addf %72, %74 : vector<256x8xf32>
    %c0_80 = arith.constant 0 : index
    %c0_81 = arith.constant 0 : index
    %c0_82 = arith.constant 0 : index
    %76 = vector.load %arg4[%c0_80, %c0_81, %c0_82] : memref<1x256x8xf32, #tpu.memory_space<vmem>>, vector<1x256x8xf32>
    %77 = vector.shape_cast %76 : vector<1x256x8xf32> to vector<256x8xf32>
    %78 = vector.shape_cast %75 : vector<256x8xf32> to vector<1x256x8xf32>
    tpu.vector_store %arg4[%c0_80, %c0_81, %c0_82], %78 {strides = array<i32>} : memref<1x256x8xf32, #tpu.memory_space<vmem>>, vector<1x256x8xf32>,
    return
  }
  func.func @transform_0(%arg0: i32) -> (i32, i32, i32, i32) {
    %c0_i32 = arith.constant 0 : i32
    %c0_i32_0 = arith.constant 0 : i32
    %c0_i32_1 = arith.constant 0 : i32
    %c0_i32_2 = arith.constant 0 : i32
    return %arg0, %c0_i32, %c0_i32_0, %c0_i32_1 : i32, i32, i32, i32
  }
  func.func @transform_1(%arg0: i32) -> (i32, i32, i32, i32) {
    %c0_i32 = arith.constant 0 : i32
    %c0_i32_0 = arith.constant 0 : i32
    %c0_i32_1 = arith.constant 0 : i32
    %c0_i32_2 = arith.constant 0 : i32
    %c0_i32_3 = arith.constant 0 : i32
    return %c0_i32, %c0_i32_0, %c0_i32_1, %c0_i32_2 : i32, i32, i32, i32
  }
  func.func @transform_2(%arg0: i32) -> (i32, i32) {
    %c0_i32 = arith.constant 0 : i32
    %c0_i32_0 = arith.constant 0 : i32
    %c0_i32_1 = arith.constant 0 : i32
    return %c0_i32, %c0_i32_0 : i32, i32
  }
  func.func @transform_3(%arg0: i32) -> (i32, i32, i32) {
    %c0_i32 = arith.constant 0 : i32
    %c0_i32_0 = arith.constant 0 : i32
    %c0_i32_1 = arith.constant 0 : i32
    return %arg0, %c0_i32, %c0_i32_0 : i32, i32, i32
  }
}

module attributes {stable_mosaic.version = 11 : i64} {
  func.func @_bn_lrelu_kernel(%arg0: i32, %arg1: memref<2x8x256xf32, #tpu.memory_space<vmem>>, %arg2: memref<8x1xf32, #tpu.memory_space<vmem>>, %arg3: memref<8x1xf32, #tpu.memory_space<vmem>>, %arg4: memref<2x8x256xf32, #tpu.memory_space<vmem>>) attributes {dimension_semantics = [#tpu.dimension_semantics<parallel>], iteration_bounds = array<i64: 1>, scalar_prefetch = 0 : i64, scratch_operands = 0 : i64, tpu.core_type = #tpu.core_type<tc>, window_params = [{transform_indices = @transform_0, window_bounds = array<i64: 2, 8, 256>}, {transform_indices = @transform_1, window_bounds = array<i64: 8, 1>}, {transform_indices = @transform_2, window_bounds = array<i64: 8, 1>}, {transform_indices = @transform_3, window_bounds = array<i64: 2, 8, 256>}]} {
    %c0 = arith.constant 0 : index
    %c0_0 = arith.constant 0 : index
    %c0_1 = arith.constant 0 : index
    %0 = vector.load %arg1[%c0, %c0_0, %c0_1] : memref<2x8x256xf32, #tpu.memory_space<vmem>>, vector<2x8x256xf32>
    %cst = arith.constant dense<0.000000e+00> : vector<8x256xf32>
    %1 = vector.multi_reduction <add>, %0, %cst [0] : vector<2x8x256xf32> to vector<8x256xf32>
    %2 = vector.shape_cast %1 : vector<8x256xf32> to vector<1x8x256xf32>
    %cst_2 = arith.constant dense<0.000000e+00> : vector<1x8xf32>
    %3 = vector.multi_reduction <add>, %2, %cst_2 [2] : vector<1x8x256xf32> to vector<1x8xf32>
    %4 = vector.shape_cast %3 : vector<1x8xf32> to vector<1x8x1xf32>
    %cst_3 = arith.constant 0.001953125 : f32
    %5 = vector.broadcast %cst_3 : f32 to vector<1x8x1xf32>
    %6 = arith.mulf %4, %5 : vector<1x8x1xf32>
    %7 = vector.broadcast %6 : vector<1x8x1xf32> to vector<2x8x256xf32>
    %8 = arith.subf %0, %7 : vector<2x8x256xf32>
    %9 = arith.mulf %8, %8 : vector<2x8x256xf32>
    %cst_4 = arith.constant dense<0.000000e+00> : vector<8x256xf32>
    %10 = vector.multi_reduction <add>, %9, %cst_4 [0] : vector<2x8x256xf32> to vector<8x256xf32>
    %11 = vector.shape_cast %10 : vector<8x256xf32> to vector<1x8x256xf32>
    %cst_5 = arith.constant dense<0.000000e+00> : vector<1x8xf32>
    %12 = vector.multi_reduction <add>, %11, %cst_5 [2] : vector<1x8x256xf32> to vector<1x8xf32>
    %13 = vector.shape_cast %12 : vector<1x8xf32> to vector<1x8x1xf32>
    %cst_6 = arith.constant 0.001953125 : f32
    %14 = vector.broadcast %cst_6 : f32 to vector<1x8x1xf32>
    %15 = arith.mulf %13, %14 : vector<1x8x1xf32>
    %c0_7 = arith.constant 0 : index
    %c0_8 = arith.constant 0 : index
    %16 = vector.load %arg2[%c0_7, %c0_8] : memref<8x1xf32, #tpu.memory_space<vmem>>, vector<8x1xf32>
    %17 = vector.shape_cast %16 : vector<8x1xf32> to vector<1x8x1xf32>
    %cst_9 = arith.constant 9.99999974E-6 : f32
    %18 = vector.broadcast %cst_9 : f32 to vector<1x8x1xf32>
    %19 = arith.addf %15, %18 : vector<1x8x1xf32>
    %20 = math.rsqrt %19 : vector<1x8x1xf32>
    %21 = arith.mulf %17, %20 : vector<1x8x1xf32>
    %22 = vector.broadcast %21 : vector<1x8x1xf32> to vector<2x8x256xf32>
    %23 = arith.mulf %8, %22 : vector<2x8x256xf32>
    %c0_10 = arith.constant 0 : index
    %c0_11 = arith.constant 0 : index
    %24 = vector.load %arg3[%c0_10, %c0_11] : memref<8x1xf32, #tpu.memory_space<vmem>>, vector<8x1xf32>
    %25 = vector.shape_cast %24 : vector<8x1xf32> to vector<1x8x1xf32>
    %26 = vector.broadcast %25 : vector<1x8x1xf32> to vector<2x8x256xf32>
    %27 = arith.addf %23, %26 : vector<2x8x256xf32>
    %cst_12 = arith.constant 0.000000e+00 : f32
    %28 = vector.broadcast %cst_12 : f32 to vector<2x8x256xf32>
    %29 = arith.cmpf ogt, %27, %28 : vector<2x8x256xf32>
    %cst_13 = arith.constant 2.000000e-01 : f32
    %30 = vector.broadcast %cst_13 : f32 to vector<2x8x256xf32>
    %31 = arith.mulf %30, %27 : vector<2x8x256xf32>
    %32 = arith.select %29, %27, %31 : vector<2x8x256xi1>, vector<2x8x256xf32>
    %c0_14 = arith.constant 0 : index
    %c0_15 = arith.constant 0 : index
    %c0_16 = arith.constant 0 : index
    %33 = vector.load %arg4[%c0_14, %c0_15, %c0_16] : memref<2x8x256xf32, #tpu.memory_space<vmem>>, vector<2x8x256xf32>
    tpu.vector_store %arg4[%c0_14, %c0_15, %c0_16], %32 {strides = array<i32>} : memref<2x8x256xf32, #tpu.memory_space<vmem>>, vector<2x8x256xf32>,
    return
  }
  func.func @transform_0(%arg0: i32) -> (i32, i32, i32) {
    %c0_i32 = arith.constant 0 : i32
    %c0_i32_0 = arith.constant 0 : i32
    %c0_i32_1 = arith.constant 0 : i32
    return %c0_i32, %arg0, %c0_i32_0 : i32, i32, i32
  }
  func.func @transform_1(%arg0: i32) -> (i32, i32) {
    %c0_i32 = arith.constant 0 : i32
    %c0_i32_0 = arith.constant 0 : i32
    return %arg0, %c0_i32 : i32, i32
  }
  func.func @transform_2(%arg0: i32) -> (i32, i32) {
    %c0_i32 = arith.constant 0 : i32
    %c0_i32_0 = arith.constant 0 : i32
    return %arg0, %c0_i32 : i32, i32
  }
  func.func @transform_3(%arg0: i32) -> (i32, i32, i32) {
    %c0_i32 = arith.constant 0 : i32
    %c0_i32_0 = arith.constant 0 : i32
    %c0_i32_1 = arith.constant 0 : i32
    return %c0_i32, %arg0, %c0_i32_0 : i32, i32, i32
  }
}

</mosaic_0001>

<bundles_post_ra>
// kernel: vgg_layer_forward.3
= control target key start
LH: loop header
LB: loop body
LE: loop exit
PB: predicated region body
PF: predicated region fallthrough
CT: control target
= control target key end

     0   :  { %v86_v20 = vmov 0   ;;  %s137_s0 = inlined_call_operand.vmem [shape: f32[2,8,256], index: 0, kind: input, shape index: {}]   ;;  %s138_s1 = inlined_call_operand.vmem [shape: f32[8,1], index: 1, kind: input, shape index: {}]   ;;  %s139_s2 = inlined_call_operand.vmem [shape: f32[8,1], index: 2, kind: input, shape index: {}]   ;;  %s140_s3 = inlined_call_operand.vmem [shape: f32[2,8,256], index: 3, kind: output, shape index: {}]  }
   0x1   :  { %v14_v0 = vld [vmem:[%s137_s0] sm:$0xff]  ;;  %v15_v1 = vld [vmem:[%s137_s0 + $0x8] sm:$0xff]  ;;  %v16_v2 = vld [vmem:[%s137_s0 + $0x10] sm:$0xff]  ;;  %82 = vset.pattern.permute.xlu1 %v86_v20  ;;  %83 = vset.pattern.permute.xlu0 %v86_v20 }
   0x2   :  { %v17_v3 = vld [vmem:[%s137_s0 + $0x18] sm:$0xff]  ;;  %v18_v4 = vadd.f32 %v16_v2, %v14_v0  ;;  %v38_v24 = vld [vmem:[%s138_s1] sm:$0xff] }
   0x3   :  { %v19_v5 = vadd.f32 %v17_v3, %v15_v1  ;;  %v51_v27 = vld [vmem:[%s139_s2] sm:$0xff] }
   0x5   :  { %v20_v6 = vadd.f32 %v19_v5, %v18_v4 }
   0x7   :  { %21 = vadd.xlane.f32.xlu0 %v20_v6 }
  0x94   :  { %v22_v7 = vpop.xlane.xlu0 %21 }
  0x95   :  { %v23_v8 = vmul.f32 0.001953125, %v22_v7 }
  0x97   :  { %v24_v9 = vsub.f32 %v14_v0, %v23_v8  ;;  %v25_v10 = vsub.f32 %v15_v1, %v23_v8  ;;  %v26_v11 = vsub.f32 %v16_v2, %v23_v8  ;;  %v27_v12 = vsub.f32 %v17_v3, %v23_v8 }
  0x99   :  { %v28_v13 = vmul.f32 %v24_v9, %v24_v9  ;;  %v29_v14 = vmul.f32 %v25_v10, %v25_v10  ;;  %v30_v15 = vmul.f32 %v26_v11, %v26_v11  ;;  %v31_v16 = vmul.f32 %v27_v12, %v27_v12 }
  0x9b   :  { %v32_v17 = vadd.f32 %v30_v15, %v28_v13  ;;  %v33_v18 = vadd.f32 %v31_v16, %v29_v14 }
  0x9d   :  { %v34_v19 = vadd.f32 %v33_v18, %v32_v17 }
  0x9f   :  { %35 = vadd.xlane.f32.xlu0 %v34_v19 }
 0x12c   :  { %v36_v21 = vpop.xlane.xlu0 %35 }
 0x12d   :  { %v37_v22 = vmul.f32 0.001953125, %v36_v21 }
 0x12f   :  { %v39_v23 = vadd.f32 1e-05, %v37_v22 }
 0x131   :  { %84 = vrsqrt.f32 %v39_v23 }
 0x13b   :  { %v85_v25 = vpop.eup %84 }
 0x13c   :  { %v41_v26 = vmul.f32 %v85_v25, %v38_v24 }
 0x13e   :  { %44 = vperm.xlu1 %82, %v41_v26  }
 0x142   :  { %54 = vperm.xlu1 %82, %v51_v27  }
 0x1bd   :  { %v45_v28 = vpop.permute.xlu1 %44 }
 0x1be   :  { %v47_v29 = vmul.f32 %v45_v28, %v24_v9  ;;  %v48_v30 = vmul.f32 %v45_v28, %v25_v10  ;;  %v49_v31 = vmul.f32 %v45_v28, %v26_v11  ;;  %v50_v32 = vmul.f32 %v45_v28, %v27_v12 }
 0x1c1   :  { %v55_v33 = vpop.permute.xlu1 %54 }
 0x1c2   :  { %v57_v34 = vadd.f32 %v55_v33, %v47_v29  ;;  %v58_v35 = vadd.f32 %v55_v33, %v48_v30  ;;  %v59_v36 = vadd.f32 %v55_v33, %v49_v31  ;;  %v60_v37 = vadd.f32 %v55_v33, %v50_v32 }
 0x1c4   :  { %vm61_vm0 = vcmp.gt.f32.partialorder %v57_v34, 0.0  ;;  %vm62_vm1 = vcmp.gt.f32.partialorder %v58_v35, 0.0  ;;  %vm63_vm2 = vcmp.gt.f32.partialorder %v59_v36, 0.0  ;;  %vm64_vm3 = vcmp.gt.f32.partialorder %v60_v37, 0.0 }
 0x1c5   :  { %v65_v38 = vmul.f32 0.2, %v57_v34  ;;  %v66_v39 = vmul.f32 0.2, %v58_v35  ;;  %v67_v40 = vmul.f32 0.2, %v59_v36 }
 0x1c6   :  { %v68_v41 = vmul.f32 0.2, %v60_v37 }
 0x1c7   :  { %v69_v42 = vsel %vm61_vm0, %v57_v34, %v65_v38  ;;  %v70_v43 = vsel %vm62_vm1, %v58_v35, %v66_v39  ;;  %v71_v44 = vsel %vm63_vm2, %v59_v36, %v67_v40 }
 0x1c8   :  { %v72_v45 = vsel %vm64_vm3, %v60_v37, %v68_v41  ;;  %73 = vst [vmem:[%s140_s3] sm:$0xff] %v69_v42  ;;  %74 = vst [vmem:[%s140_s3 + $0x8] sm:$0xff] %v70_v43 }
 0x1c9   :  { %75 = vst [vmem:[%s140_s3 + $0x10] sm:$0xff] %v71_v44  ;;  %76 = vst [vmem:[%s140_s3 + $0x18] sm:$0xff] %v72_v45 }

// kernel: vgg_layer_forward.2
= control target key start
LH: loop header
LB: loop body
LE: loop exit
PB: predicated region body
PF: predicated region fallthrough
CT: control target
= control target key end

     0   :  { %s4004_s12 = smov 0   ;;  %s4675_s0 = inlined_call_operand.vmem [shape: f32[2,18,18,4], index: 0, kind: input, shape index: {}]   ;;  %s4676_s1 = inlined_call_operand.vmem [shape: bf16[3,3,4,8], index: 1, kind: input, shape index: {}]   ;;  %s4677_s2 = inlined_call_operand.vmem [shape: f32[1,8], index: 2, kind: input, shape index: {}]   ;;  %s4678_s3 = inlined_call_operand.vmem [shape: f32[2,256,8], index: 3, kind: output, shape index: {}]  }
   0x1 LB: > { %s2884_s13 = sadd.s32 4294967295, %s3982_s12   ;;  %p2888_p0 = scmp.ge.s32.totalorder %s3982_s12, 1  ;;  %s3982_s12 = sphi %s4004_s12, %s13_s12  }
   0x2   : > { %p137_p1 = scmp.lt.s32.totalorder %s3982_s12, 3 }
   0x4   : > { %p138_p2 = pnand %p2888_p0, %p137_p1 }
   0x5   : > { %v2892_v0 = vld [vmem:[%s4676_s1 + $0x2] sm:$0x3] (!%p138_p2)  ;;  %vm320_vm0 = vcmask (!%p138_p2), 1041408   ;;  %v4018_v1 = vld [vmem:[%s4676_s1 + $0x8] sm:$0x3] (!%p138_p2)  ;;  %p161_p3 = scmp.lt.s32.totalorder (!%p138_p2), %s2884_s13, 1 }
   0x6   : > { %141 = sbr.rel (%p138_p2) target bundleno = 522 (0x20a), region = 32  ;;  %3957 = vmatprep.subr.msk.bf16.mxu1 (!%p138_p2), %vm320_vm0, %v2892_v0  ;;  %3961 = vmatprep.subr.msk.bf16.mxu0 (!%p138_p2), %vm320_vm0, %v4018_v1  ;;  %v322_v2 = vsel (!%p138_p2), %vm320_vm0, %v2892_v0, 0  ;;  %v4026_v3 = vsel (!%p138_p2), %vm320_vm0, %v4018_v1, 0  ;;  %v220_v4 = vld [vmem:[%s4676_s1] sm:$0x3] (!%p138_p2)  ;;  %vm271_vm1 = vcmask (!%p138_p2), 31744  }
   0x7   : > { %3394 = vmatpush3.bf16.msra.mxu1 (!%p138_p2), %v322_v2  ;;  %3530 = vmatpush3.bf16.msra.mxu0 (!%p138_p2), %v4026_v3  ;;  %v3072_v5 = vld [vmem:[%s4676_s1 + $0xa] sm:$0x3] (!%p138_p2)  ;;  %v534_v14 = vsel (!%p138_p2), %vm320_vm0, %v220_v4, 0  ;;  %v3121_v20 = vld [vmem:[%s4676_s1 + $0xc] sm:$0x3] (!%p138_p2)  ;;  %vm2796_vm2 = vcmask (!%p138_p2), 64512  }
   0x8   : > { %3958 = vmatprep.subr.msk.bf16.mxu1 (!%p138_p2), %vm320_vm0, %v220_v4  ;;  %3963 = vmatprep.subr.msk.bf16.mxu0 (!%p138_p2), %vm320_vm0, %v3072_v5  ;;  %v1679_v18 = vsel (!%p138_p2), %vm320_vm0, %v3072_v5, 0  ;;  %v4070_v21 = vld [vmem:[%s4676_s1 + $0x4] sm:$0x3] (!%p138_p2)  ;;  %v1974_v52 = vsel (!%p138_p2), %vm320_vm0, %v3121_v20, 0  ;;  %v4149_v53 = vld [vmem:[%s4676_s1 + $0xe] sm:$0x3] (!%p138_p2) }
   0xd   : > { %s4680_s13 = smov (!%p161_p3, %s2884_s13), 1 }
   0xe   : > { %s3967_s22 = smul.u32 432, %s4680_s13  ;;  %s3239_s9 = sshll.u32 %s4680_s13, 8 }
   0xf   : > { %s4574_s16 = scalar_lea.vmem %s4678_s3, %s3239_s9 }
  0x10   : > { %s4043_s25 = scalar_lea.vmem %s4675_s0, %s3967_s22 }
  0x11   : > { %v221_v6 = vld [vmem:[%s4043_s25 + $0x1] sm:$0xff]  ;;  %v222_v7 = vld [vmem:[%s4043_s25 + $0x9] sm:$0xff]  ;;  %v2991_v8 = vld [vmem:[%s4043_s25 + $0x19] sm:$0xff] }
  0x12   : > { %v253_v9 = vpack.c.bf16 %v222_v7, %v221_v6  ;;  %v2992_v10 = vld [vmem:[%s4043_s25 + $0x21] sm:$0xff]  ;;  %v2993_v11 = vld [vmem:[%s4043_s25 + $0x31] sm:$0xff]  ;;  %v2994_v12 = vld [vmem:[%s4043_s25 + $0x39] sm:$0xff] }
  0x13   : > { %v1318_v13 = vpack.c.bf16 %v2992_v10, %v2991_v8  ;;  %v4052_v15 = vpack.c.bf16 %v2994_v12, %v2993_v11  ;;  %v2995_v16 = vld [vmem:[%s4043_s25 + $0x49] sm:$0xff]  ;;  %v2996_v17 = vld [vmem:[%s4043_s25 + $0x51] sm:$0xff]  ;;  %v2997_v22 = vld [vmem:[%s4043_s25 + $0x61] sm:$0xff] }
  0x14   : > { %3395 = vmatprep.mubr.msk.bf16.mxu1 %vm271_vm1, %v253_v9  ;;  %v4058_v19 = vpack.c.bf16 %v2996_v17, %v2995_v16  ;;  %v2998_v23 = vld [vmem:[%s4043_s25 + $0x69] sm:$0xff]  ;;  %v2999_v24 = vld [vmem:[%s4043_s25 + $0x79] sm:$0xff]  ;;  %v3000_v25 = vld [vmem:[%s4043_s25 + $0x81] sm:$0xff] }
  0x15   : > { %3531 = vmatprep.mubr.msk.bf16.mxu0 %vm271_vm1, %v1318_v13  ;;  %3396 = vmatmul.mubr.msk.bf16.vlgmr.msra.gmra.mrb[0].mxu1 %vm271_vm1, %v1318_v13  ;;  %v4083_v26 = vpack.c.bf16 %v2998_v23, %v2997_v22  ;;  %v4085_v27 = vpack.c.bf16 %v3000_v25, %v2999_v24  ;;  %v3001_v28 = vld [vmem:[%s4043_s25 + $0x91] sm:$0xff]  ;;  %v3002_v29 = vld [vmem:[%s4043_s25 + $0x99] sm:$0xff]  ;;  %v3003_v30 = vld [vmem:[%s4043_s25 + $0xa9] sm:$0xff] }
  0x16   : > { %3428 = vmatpush3.bf16.msra.mxu1 %v534_v14  ;;  %3532 = vmatmul.mubr.msk.bf16.vlgmr.msra.gmra.mrb[0].mxu0 %vm271_vm1, %v4052_v15  ;;  %v3004_v31 = vld [vmem:[%s4043_s25 + $0xb1] sm:$0xff]  ;;  %v4099_v32 = vpack.c.bf16 %v3002_v29, %v3001_v28  ;;  %v3005_v34 = vld [vmem:[%s4043_s25 + $0xc1] sm:$0xff]  ;;  %v3006_v35 = vld [vmem:[%s4043_s25 + $0xc9] sm:$0xff] }
  0x17   : > { %3564 = vmatpush3.bf16.msra.mxu0 %v1679_v18  ;;  %3399 = vmatprep.mubr.msk.bf16.mxu1 %vm271_vm1, %v4052_v15  ;;  %v4101_v33 = vpack.c.bf16 %v3004_v31, %v3003_v30  ;;  %v3040_v36 = vld [vmem:[%s4043_s25 + $0x1a] sm:$0xff]  ;;  %v3041_v37 = vld [vmem:[%s4043_s25 + $0x22] sm:$0xff]  ;;  %v4115_v38 = vpack.c.bf16 %v3006_v35, %v3005_v34  ;;  %v3042_v42 = vld [vmem:[%s4043_s25 + $0x32] sm:$0xff] }
  0x18   : > { %3535 = vmatprep.mubr.msk.bf16.mxu0 %vm271_vm1, %v4058_v19  ;;  %3964 = vmatprep.subr.msk.bf16.mxu0 %vm320_vm0, %v3121_v20  ;;  %v4117_v39 = vpack.c.bf16 %v3041_v37, %v3040_v36  ;;  %v239_v40 = vld [vmem:[%s4043_s25 + $0xd9] sm:$0xff]  ;;  %v240_v41 = vld [vmem:[%s4043_s25 + $0xe1] sm:$0xff]  ;;  %v241_v44 = vld [vmem:[%s4043_s25 + $0xf1] sm:$0xff] }
  0x19   : > { %3959 = vmatprep.subr.msk.bf16.mxu1 %vm320_vm0, %v4070_v21  ;;  %v3043_v43 = vld [vmem:[%s4043_s25 + $0x3a] sm:$0xff]  ;;  %v3044_v46 = vld [vmem:[%s4043_s25 + $0x4a] sm:$0xff]  ;;  %v3045_v47 = vld [vmem:[%s4043_s25 + $0x52] sm:$0xff]  ;;  %v4135_v48 = vpack.c.bf16 %v240_v41, %v239_v40 }
  0x1a   : > { %v242_v45 = vld [vmem:[%s4043_s25 + $0xf9] sm:$0xff]  ;;  %v4137_v49 = vpack.c.bf16 %v3043_v43, %v3042_v42  ;;  %v4141_v51 = vpack.c.bf16 %v3045_v47, %v3044_v46  ;;  %v243_v54 = vld [vmem:[%s4043_s25 + $0x109] sm:$0xff]  ;;  %v244_v55 = vld [vmem:[%s4043_s25 + $0x111] sm:$0xff]  ;;  %v796_v47 = vsel %vm320_vm0, %v4070_v21, 0 }
  0x1b   : > { %v4139_v50 = vpack.c.bf16 %v242_v45, %v241_v44  ;;  %v3046_v56 = vld [vmem:[%s4043_s25 + $0x62] sm:$0xff]  ;;  %v3047_v57 = vld [vmem:[%s4043_s25 + $0x6a] sm:$0xff]  ;;  %v3048_v60 = vld [vmem:[%s4043_s25 + $0x7a] sm:$0xff]  ;;  %v4167_v62 = vpack.c.bf16 %v244_v55, %v243_v54 }
  0x1c   : > { %v245_v58 = vld [vmem:[%s4043_s25 + $0x121] sm:$0xff]  ;;  %v246_v59 = vld [vmem:[%s4043_s25 + $0x129] sm:$0xff]  ;;  %v4169_v63 = vpack.c.bf16 %v3047_v57, %v3046_v56  ;;  %v247_v4 = vld [vmem:[%s4043_s25 + $0x139] sm:$0xff] }
  0x1d   : > { %3400 = vmatmul.mubr.msk.bf16.gmra.mrb[4].mxu1 %vm271_vm1, %v4058_v19  ;;  %v3049_v61 = vld [vmem:[%s4043_s25 + $0x82] sm:$0xff]  ;;  %v4171_v0 = vpack.c.bf16 %v246_v59, %v245_v58  ;;  %v3050_v6 = vld [vmem:[%s4043_s25 + $0x92] sm:$0xff]  ;;  %v3051_v7 = vld [vmem:[%s4043_s25 + $0x9a] sm:$0xff] }
  0x1e   : > { %3536 = vmatmul.mubr.msk.bf16.gmra.mrb[4].mxu0 %vm271_vm1, %v4083_v26  ;;  %3403 = vmatprep.mubr.msk.bf16.mxu1 %vm271_vm1, %v4083_v26  ;;  %v4173_v2 = vpack.c.bf16 %v3049_v61, %v3048_v60  ;;  %v248_v5 = vld [vmem:[%s4043_s25 + $0x141] sm:$0xff]  ;;  %v249_v8 = vld [vmem:[%s4043_s25 + $0x151] sm:$0xff]  ;;  %v250_v9 = vld [vmem:[%s4043_s25 + $0x159] sm:$0xff]  ;;  %v4193_v13 = vpack.c.bf16 %v3051_v7, %v3050_v6 }
  0x1f   : > { %3539 = vmatprep.mubr.msk.bf16.mxu0 %vm271_vm1, %v4085_v27  ;;  %v3052_v10 = vld [vmem:[%s4043_s25 + $0xaa] sm:$0xff]  ;;  %v3053_v11 = vld [vmem:[%s4043_s25 + $0xb2] sm:$0xff]  ;;  %v4191_v12 = vpack.c.bf16 %v248_v5, %v247_v4  ;;  %v4195_v14 = vpack.c.bf16 %v250_v9, %v249_v8  ;;  %v3054_v20 = vld [vmem:[%s4043_s25 + $0xc2] sm:$0xff] }
  0x20   : > { %v4197_v16 = vpack.c.bf16 %v3053_v11, %v3052_v10  ;;  %v251_v17 = vld [vmem:[%s4043_s25 + $0x169] sm:$0xff]  ;;  %v252_v18 = vld [vmem:[%s4043_s25 + $0x171] sm:$0xff]  ;;  %v172_v23 = vld [vmem:[%s4043_s25] sm:$0xff] }
  0x21   : > { %v3055_v22 = vld [vmem:[%s4043_s25 + $0xca] sm:$0xff]  ;;  %v3056_v25 = vld [vmem:[%s4043_s25 + $0xda] sm:$0xff]  ;;  %v3057_v28 = vld [vmem:[%s4043_s25 + $0xe2] sm:$0xff]  ;;  %v4215_v29 = vpack.c.bf16 %v252_v18, %v251_v17 }
  0x22   : > { %v173_v24 = vld [vmem:[%s4043_s25 + $0x8] sm:$0xff]  ;;  %v4217_v30 = vpack.c.bf16 %v3055_v22, %v3054_v20  ;;  %v4219_v34 = vpack.c.bf16 %v3057_v28, %v3056_v25  ;;  %v174_v35 = vld [vmem:[%s4043_s25 + $0x18] sm:$0xff]  ;;  %v175_v36 = vld [vmem:[%s4043_s25 + $0x20] sm:$0xff] }
  0x23   : > { %v204_v31 = vpack.c.bf16 %v173_v24, %v172_v23  ;;  %v3058_v37 = vld [vmem:[%s4043_s25 + $0xf2] sm:$0xff]  ;;  %v3059_v40 = vld [vmem:[%s4043_s25 + $0xfa] sm:$0xff]  ;;  %v3060_v43 = vld [vmem:[%s4043_s25 + $0x10a] sm:$0xff]  ;;  %v4236_v45 = vpack.c.bf16 %v175_v36, %v174_v35 }
  0x24   : > { %v176_v41 = vld [vmem:[%s4043_s25 + $0x30] sm:$0xff]  ;;  %v177_v42 = vld [vmem:[%s4043_s25 + $0x38] sm:$0xff]  ;;  %v4238_v46 = vpack.c.bf16 %v3059_v40, %v3058_v37  ;;  %v4251_v55 = vld [vmem:[%s4676_s1 + $0x6] sm:$0x3] }
  0x25   : > { %3404 = vmatmul.mubr.msk.bf16.gmra.mrb[8].mxu1 %vm271_vm1, %v4085_v27  ;;  %v3061_v44 = vld [vmem:[%s4043_s25 + $0x112] sm:$0xff]  ;;  %v178_v56 = vld [vmem:[%s4043_s25 + $0x48] sm:$0xff]  ;;  %v180_v59 = vld [vmem:[%s4043_s25 + $0x60] sm:$0xff] }
  0x26   : > { %3540 = vmatmul.mubr.msk.bf16.gmra.mrb[8].mxu0 %vm271_vm1, %v4099_v32  ;;  %3407 = vmatprep.mubr.msk.bf16.mxu1 %vm271_vm1, %v4099_v32  ;;  %v4244_v54 = vpack.c.bf16 %v3061_v44, %v3060_v43  ;;  %v179_v57 = vld [vmem:[%s4043_s25 + $0x50] sm:$0xff]  ;;  %v3062_v21 = vld [vmem:[%s4043_s25 + $0x122] sm:$0xff]  ;;  %v3064_v61 = vld [vmem:[%s4043_s25 + $0x13a] sm:$0xff] }
  0x27   : > { %3543 = vmatprep.mubr.msk.bf16.mxu0 %vm271_vm1, %v4101_v33  ;;  %v3063_v58 = vld [vmem:[%s4043_s25 + $0x12a] sm:$0xff]  ;;  %v3065_v4 = vld [vmem:[%s4043_s25 + $0x142] sm:$0xff]  ;;  %v4269_v5 = vpack.c.bf16 %v179_v57, %v178_v56  ;;  %v182_v9 = vld [vmem:[%s4043_s25 + $0x78] sm:$0xff] }
  0x28   : > { %v181_v60 = vld [vmem:[%s4043_s25 + $0x68] sm:$0xff]  ;;  %v4271_v6 = vpack.c.bf16 %v3063_v58, %v3062_v21  ;;  %v4275_v8 = vpack.c.bf16 %v3065_v4, %v3064_v61  ;;  %v183_v10 = vld [vmem:[%s4043_s25 + $0x80] sm:$0xff]  ;;  %v3066_v11 = vld [vmem:[%s4043_s25 + $0x152] sm:$0xff]  ;;  %v2268_v61 = vsel %vm320_vm0, %v4149_v53, 0 }
  0x29   : > { %v4273_v7 = vpack.c.bf16 %v181_v60, %v180_v59  ;;  %v3067_v17 = vld [vmem:[%s4043_s25 + $0x15a] sm:$0xff]  ;;  %v184_v18 = vld [vmem:[%s4043_s25 + $0x90] sm:$0xff]  ;;  %v4293_v24 = vpack.c.bf16 %v183_v10, %v182_v9  ;;  %v186_v35 = vld [vmem:[%s4043_s25 + $0xa8] sm:$0xff] }
  0x2a   : > { %v185_v20 = vld [vmem:[%s4043_s25 + $0x98] sm:$0xff]  ;;  %v3068_v22 = vld [vmem:[%s4043_s25 + $0x16a] sm:$0xff]  ;;  %v4295_v25 = vpack.c.bf16 %v3067_v17, %v3066_v11  ;;  %v3070_v37 = vld [vmem:[%s4043_s25 + $0x182] sm:$0xff] }
  0x2b   : > { %v3069_v23 = vld [vmem:[%s4043_s25 + $0x172] sm:$0xff]  ;;  %v4297_v28 = vpack.c.bf16 %v185_v20, %v184_v18  ;;  %v3071_v40 = vld [vmem:[%s4043_s25 + $0x18a] sm:$0xff]  ;;  %v191_v57 = vld [vmem:[%s4043_s25 + $0xe0] sm:$0xff] }
  0x2c   : > { %v187_v36 = vld [vmem:[%s4043_s25 + $0xb0] sm:$0xff]  ;;  %v4317_v44 = vpack.c.bf16 %v3071_v40, %v3070_v37  ;;  %v190_v56 = vld [vmem:[%s4043_s25 + $0xd8] sm:$0xff]  ;;  %v194_v9 = vld [vmem:[%s4043_s25 + $0x108] sm:$0xff] }
  0x2d   : > { %3408 = vmatmul.mubr.msk.bf16.gmra.mrb[12].mxu1 %vm271_vm1, %v4101_v33  ;;  %v4315_v43 = vpack.c.bf16 %v187_v36, %v186_v35  ;;  %v192_v21 = vld [vmem:[%s4043_s25 + $0xf0] sm:$0xff]  ;;  %v193_v58 = vld [vmem:[%s4043_s25 + $0xf8] sm:$0xff]  ;;  %v4333_v59 = vpack.c.bf16 %v191_v57, %v190_v56  ;;  %v197_v11 = vld [vmem:[%s4043_s25 + $0x128] sm:$0xff] }
  0x2e   : > { %3544 = vmatmul.mubr.msk.bf16.gmra.mrb[12].mxu0 %vm271_vm1, %v4115_v38  ;;  %3411 = vmatprep.mubr.msk.bf16.mxu1 %vm271_vm1, %v4115_v38  ;;  %v4335_v60 = vpack.c.bf16 %v193_v58, %v192_v21  ;;  %v3219_v4 = vld [vmem:[%s4676_s1 + $0x10] sm:$0x3]  ;;  %v198_v20 = vld [vmem:[%s4043_s25 + $0x138] sm:$0xff]  ;;  %v202_v40 = vld [vmem:[%s4043_s25 + $0x168] sm:$0xff]  ;;  %v1091_v58 = vsel %vm320_vm0, %v4251_v55, 0 }
  0x2f   : > { %3565 = vmatprep.mubr.msk.bf16.mxu0 %vm271_vm1, %v4117_v39  ;;  %v195_v10 = vld [vmem:[%s4043_s25 + $0x110] sm:$0xff]  ;;  %v201_v35 = vld [vmem:[%s4043_s25 + $0x158] sm:$0xff] }
  0x30   : > { %v4355_v17 = vpack.c.bf16 %v195_v10, %v194_v9  ;;  %v698_v56 = vld [vmem:[%s4043_s25 + $0xa] sm:$0xff]  ;;  %v3120_v9 = vld [vmem:[%s4043_s25 + $0x1a0] sm:$0xff] }
  0x35   : > { %3412 = vmatmul.mubr.msk.bf16.gmra.mrb[16].mxu1 %vm271_vm1, %v4135_v48 }
  0x36   : > { %3566 = vmatmul.mubr.msk.bf16.vlgmr.msra.gmra.mrb[0].mxu0 %vm271_vm1, %v4137_v49  ;;  %3415 = vmatprep.mubr.msk.bf16.mxu1 %vm271_vm1, %v4139_v50 }
  0x37   : > { %3598 = vmatpush3.bf16.msra.mxu0 %v1974_v52  ;;  %3569 = vmatprep.mubr.msk.bf16.mxu0 %vm271_vm1, %v4141_v51  ;;  %v4242_v52 = vpack.c.bf16 %v177_v42, %v176_v41  ;;  %v188_v41 = vld [vmem:[%s4043_s25 + $0xc0] sm:$0xff]  ;;  %v189_v42 = vld [vmem:[%s4043_s25 + $0xc8] sm:$0xff] }
  0x38   : > { %3965 = vmatprep.subr.msk.bf16.mxu0 %vm320_vm0, %v4149_v53  ;;  %v196_v53 = vld [vmem:[%s4043_s25 + $0x120] sm:$0xff] }
  0x39   : > { %v4357_v18 = vpack.c.bf16 %v197_v11, %v196_v53  ;;  %v2562_v53 = vsel %vm320_vm0, %v3219_v4, 0 }
  0x3d   : > { %3416 = vmatmul.mubr.msk.bf16.gmra.mrb[20].mxu1 %vm271_vm1, %v4167_v62 }
  0x3e   : > { %3570 = vmatmul.mubr.msk.bf16.gmra.mrb[4].mxu0 %vm271_vm1, %v4169_v63  ;;  %3419 = vmatprep.mubr.msk.bf16.mxu1 %vm271_vm1, %v4171_v0 }
  0x3f   : > { %3573 = vmatprep.mubr.msk.bf16.mxu0 %vm271_vm1, %v4173_v2 }
  0x45   : > { %3420 = vmatmul.mubr.msk.bf16.gmra.mrb[24].mxu1 %vm271_vm1, %v4191_v12 }
  0x46   : > { %3574 = vmatmul.mubr.msk.bf16.gmra.mrb[8].mxu0 %vm271_vm1, %v4193_v13  ;;  %3423 = vmatprep.mubr.msk.bf16.mxu1 %vm271_vm1, %v4195_v14 }
  0x47   : > { %3577 = vmatprep.mubr.msk.bf16.mxu0 %vm271_vm1, %v4197_v16 }
  0x4d   : > { %3424 = vmatmul.mubr.msk.bf16.gmra.mrb[28].mxu1 %vm271_vm1, %v4215_v29 }
  0x4e   : > { %3578 = vmatmul.mubr.msk.bf16.gmra.mrb[12].mxu0 %vm271_vm1, %v4217_v30  ;;  %3429 = vmatprep.mubr.msk.bf16.mxu1 %vm271_vm1, %v204_v31  ;;  %v4299_v31 = vpack.c.bf16 %v3069_v23, %v3068_v22  ;;  %v199_v22 = vld [vmem:[%s4043_s25 + $0x140] sm:$0xff]  ;;  %v200_v23 = vld [vmem:[%s4043_s25 + $0x150] sm:$0xff] }
  0x4f   : > { %3581 = vmatprep.mubr.msk.bf16.mxu0 %vm271_vm1, %v4219_v34  ;;  %v4371_v36 = vpack.c.bf16 %v199_v22, %v198_v20  ;;  %v4373_v37 = vpack.c.bf16 %v201_v35, %v200_v23 }
  0x55   : > { %3430 = vmatmul.mubr.msk.bf16.vlgmr.msra.gmra.mrb[0].mxu1 %vm271_vm1, %v4236_v45 }
  0x56   : > { %3462 = vmatpush3.bf16.msra.mxu1 %v796_v47  ;;  %3582 = vmatmul.mubr.msk.bf16.gmra.mrb[16].mxu0 %vm271_vm1, %v4238_v46  ;;  %v4319_v47 = vpack.c.bf16 %v189_v42, %v188_v41  ;;  %v203_v41 = vld [vmem:[%s4043_s25 + $0x170] sm:$0xff]  ;;  %v697_v42 = vld [vmem:[%s4043_s25 + $0x2] sm:$0xff] }
  0x57   : > { %3433 = vmatprep.mubr.msk.bf16.mxu1 %vm271_vm1, %v4242_v52  ;;  %3585 = vmatprep.mubr.msk.bf16.mxu0 %vm271_vm1, %v4244_v54  ;;  %v4387_v57 = vpack.c.bf16 %v203_v41, %v202_v40  ;;  %v729_v21 = vpack.c.bf16 %v698_v56, %v697_v42 }
  0x58   : > { %3960 = vmatprep.subr.msk.bf16.mxu1 %vm320_vm0, %v4251_v55  ;;  %v3118_v55 = vld [vmem:[%s4043_s25 + $0x188] sm:$0xff] }
  0x5d   : > { %3434 = vmatmul.mubr.msk.bf16.gmra.mrb[4].mxu1 %vm271_vm1, %v4269_v5 }
  0x5e   : > { %3586 = vmatmul.mubr.msk.bf16.gmra.mrb[20].mxu0 %vm271_vm1, %v4271_v6  ;;  %3437 = vmatprep.mubr.msk.bf16.mxu1 %vm271_vm1, %v4273_v7 }
  0x5f   : > { %3589 = vmatprep.mubr.msk.bf16.mxu0 %vm271_vm1, %v4275_v8 }
  0x65   : > { %3438 = vmatmul.mubr.msk.bf16.gmra.mrb[8].mxu1 %vm271_vm1, %v4293_v24 }
  0x66   : > { %3590 = vmatmul.mubr.msk.bf16.gmra.mrb[24].mxu0 %vm271_vm1, %v4295_v25  ;;  %3441 = vmatprep.mubr.msk.bf16.mxu1 %vm271_vm1, %v4297_v28 }
  0x67   : > { %3593 = vmatprep.mubr.msk.bf16.mxu0 %vm271_vm1, %v4299_v31 }
  0x6d   : > { %3442 = vmatmul.mubr.msk.bf16.gmra.mrb[12].mxu1 %vm271_vm1, %v4315_v43 }
  0x6e   : > { %3594 = vmatmul.mubr.msk.bf16.gmra.mrb[28].mxu0 %vm271_vm1, %v4317_v44  ;;  %3445 = vmatprep.mubr.msk.bf16.mxu1 %vm271_vm1, %v4319_v47 }
  0x6f   : > { %3599 = vmatprep.mubr.msk.bf16.mxu0 %vm271_vm1, %v4242_v52 }
  0x75   : > { %3446 = vmatmul.mubr.msk.bf16.gmra.mrb[16].mxu1 %vm271_vm1, %v4333_v59 }
  0x76   : > { %3600 = vmatmul.mubr.msk.bf16.vlgmr.msra.gmra.mrb[0].mxu0 %vm271_vm1, %v4269_v5  ;;  %3449 = vmatprep.mubr.msk.bf16.mxu1 %vm271_vm1, %v4335_v60 }
  0x77   : > { %3632 = vmatpush3.bf16.msra.mxu0 %v2268_v61  ;;  %3603 = vmatprep.mubr.msk.bf16.mxu0 %vm271_vm1, %v4273_v7 }
  0x78   : > { %3966 = vmatprep.subr.msk.bf16.mxu0 %vm320_vm0, %v3219_v4 }
  0x7d   : > { %3450 = vmatmul.mubr.msk.bf16.gmra.mrb[20].mxu1 %vm271_vm1, %v4355_v17 }
  0x7e   : > { %3604 = vmatmul.mubr.msk.bf16.gmra.mrb[4].mxu0 %vm271_vm1, %v4293_v24  ;;  %3453 = vmatprep.mubr.msk.bf16.mxu1 %vm271_vm1, %v4357_v18 }
  0x7f   : > { %3607 = vmatprep.mubr.msk.bf16.mxu0 %vm271_vm1, %v4297_v28 }
  0x85   : > { %3454 = vmatmul.mubr.msk.bf16.gmra.mrb[24].mxu1 %vm271_vm1, %v4371_v36 }
  0x86   : > { %3608 = vmatmul.mubr.msk.bf16.gmra.mrb[8].mxu0 %vm271_vm1, %v4315_v43  ;;  %3457 = vmatprep.mubr.msk.bf16.mxu1 %vm271_vm1, %v4373_v37 }
  0x87   : > { %3611 = vmatprep.mubr.msk.bf16.mxu0 %vm271_vm1, %v4319_v47 }
  0x8d   : > { %3458 = vmatmul.mubr.msk.bf16.gmra.mrb[28].mxu1 %vm271_vm1, %v4387_v57 }
  0x8e   : > { %3612 = vmatmul.mubr.msk.bf16.gmra.mrb[12].mxu0 %vm271_vm1, %v4333_v59  ;;  %3463 = vmatprep.mubr.msk.bf16.mxu1 %vm271_vm1, %v729_v21 }
  0x8f   : > { %3615 = vmatprep.mubr.msk.bf16.mxu0 %vm271_vm1, %v4335_v60 }
  0x95   : > { %3464 = vmatmul.mubr.msk.bf16.vlgmr.msra.gmra.mrb[0].mxu1 %vm271_vm1, %v4117_v39  ;;  %v3117_v39 = vld [vmem:[%s4043_s25 + $0x180] sm:$0xff] }
  0x96   : > { %3496 = vmatpush3.bf16.msra.mxu1 %v1091_v58  ;;  %3616 = vmatmul.mubr.msk.bf16.gmra.mrb[16].mxu0 %vm271_vm1, %v4355_v17  ;;  %v4418_v61 = vpack.c.bf16 %v3118_v55, %v3117_v39 }
  0x97   : > { %3467 = vmatprep.mubr.msk.bf16.mxu1 %vm271_vm1, %v4137_v49  ;;  %3619 = vmatprep.mubr.msk.bf16.mxu0 %vm271_vm1, %v4357_v18 }
  0x98   : > { %3962 = vmatprep.subr.msk.bf16.mxu1 %vm320_vm0, %v4018_v1  ;;  %v3119_v1 = vld [vmem:[%s4043_s25 + $0x198] sm:$0xff] }
  0x99   : > { %v1922_v10 = vpack.c.bf16 %v3120_v9, %v3119_v1 }
  0x9d   : > { %3468 = vmatmul.mubr.msk.bf16.gmra.mrb[4].mxu1 %vm271_vm1, %v4141_v51 }
  0x9e   : > { %3620 = vmatmul.mubr.msk.bf16.gmra.mrb[20].mxu0 %vm271_vm1, %v4371_v36  ;;  %3471 = vmatprep.mubr.msk.bf16.mxu1 %vm271_vm1, %v4169_v63 }
  0x9f   : > { %3623 = vmatprep.mubr.msk.bf16.mxu0 %vm271_vm1, %v4373_v37 }
  0xa5   : > { %3472 = vmatmul.mubr.msk.bf16.gmra.mrb[8].mxu1 %vm271_vm1, %v4173_v2 }
  0xa6   : > { %3624 = vmatmul.mubr.msk.bf16.gmra.mrb[24].mxu0 %vm271_vm1, %v4387_v57  ;;  %3475 = vmatprep.mubr.msk.bf16.mxu1 %vm271_vm1, %v4193_v13 }
  0xa7   : > { %3627 = vmatprep.mubr.msk.bf16.mxu0 %vm271_vm1, %v4418_v61 }
  0xad   : > { %3476 = vmatmul.mubr.msk.bf16.gmra.mrb[12].mxu1 %vm271_vm1, %v4197_v16 }
  0xae   : > { %3628 = vmatmul.mubr.msk.bf16.gmra.mrb[28].mxu0 %vm271_vm1, %v1922_v10  ;;  %3479 = vmatprep.mubr.msk.bf16.mxu1 %vm271_vm1, %v4217_v30 }
  0xaf   : > { %3633 = vmatprep.mubr.msk.bf16.mxu0 %vm271_vm1, %v4052_v15  ;;  %v3167_v15 = vld [vmem:[%s4043_s25 + $0x189] sm:$0xff] }
  0xb5   : > { %3480 = vmatmul.mubr.msk.bf16.gmra.mrb[16].mxu1 %vm271_vm1, %v4219_v34 }
  0xb6   : > { %3634 = vmatmul.mubr.msk.bf16.vlgmr.msra.gmra.mrb[0].mxu0 %vm271_vm1, %v4058_v19  ;;  %3483 = vmatprep.mubr.msk.bf16.mxu1 %vm271_vm1, %v4238_v46 }
  0xb7   : > { %3666 = vmatpush3.bf16.msra.mxu0 %v2562_v53  ;;  %3637 = vmatprep.mubr.msk.bf16.mxu0 %vm271_vm1, %v4083_v26  ;;  %v3168_v26 = vld [vmem:[%s4043_s25 + $0x199] sm:$0xff] }
  0xbd   : > { %3484 = vmatmul.mubr.msk.bf16.gmra.mrb[20].mxu1 %vm271_vm1, %v4244_v54 }
  0xbe   : > { %3638 = vmatmul.mubr.msk.bf16.gmra.mrb[4].mxu0 %vm271_vm1, %v4085_v27  ;;  %3487 = vmatprep.mubr.msk.bf16.mxu1 %vm271_vm1, %v4271_v6  ;;  %v3169_v27 = vld [vmem:[%s4043_s25 + $0x1a1] sm:$0xff] }
  0xbf   : > { %3641 = vmatprep.mubr.msk.bf16.mxu0 %vm271_vm1, %v4099_v32  ;;  %v2216_v32 = vpack.c.bf16 %v3169_v27, %v3168_v26 }
  0xc5   : > { %3488 = vmatmul.mubr.msk.bf16.gmra.mrb[24].mxu1 %vm271_vm1, %v4275_v8 }
  0xc6   : > { %3642 = vmatmul.mubr.msk.bf16.gmra.mrb[8].mxu0 %vm271_vm1, %v4101_v33  ;;  %3491 = vmatprep.mubr.msk.bf16.mxu1 %vm271_vm1, %v4295_v25  ;;  %v3217_v33 = vld [vmem:[%s4043_s25 + $0x19a] sm:$0xff] }
  0xc7   : > { %3645 = vmatprep.mubr.msk.bf16.mxu0 %vm271_vm1, %v4115_v38  ;;  %v3218_v38 = vld [vmem:[%s4043_s25 + $0x1a2] sm:$0xff] }
  0xcd   : > { %3492 = vmatmul.mubr.msk.bf16.gmra.mrb[28].mxu1 %vm271_vm1, %v4299_v31 }
  0xce   : > { %3646 = vmatmul.mubr.msk.bf16.gmra.mrb[12].mxu0 %vm271_vm1, %v4135_v48  ;;  %3497 = vmatprep.mubr.msk.bf16.mxu1 %vm271_vm1, %v4236_v45 }
  0xcf   : > { %3649 = vmatprep.mubr.msk.bf16.mxu0 %vm271_vm1, %v4139_v50 }
  0xd5   : > { %3498 = vmatmul.mubr.msk.bf16.vlgmr.msra.gmra.mrb[0].mxu1 %vm271_vm1, %v4242_v52 }
  0xd6   : > { %3700 = vmatpush3.bf16.msra.mxu1 %v4026_v3  ;;  %3650 = vmatmul.mubr.msk.bf16.gmra.mrb[16].mxu0 %vm271_vm1, %v4167_v62  ;;  %v3166_v3 = vld [vmem:[%s4043_s25 + $0x181] sm:$0xff] }
  0xd7   : > { %3501 = vmatprep.mubr.msk.bf16.mxu1 %vm271_vm1, %v4269_v5  ;;  %3653 = vmatprep.mubr.msk.bf16.mxu0 %vm271_vm1, %v4171_v0  ;;  %v2215_v19 = vpack.c.bf16 %v3167_v15, %v3166_v3 }
  0xdd   : > { %3502 = vmatmul.mubr.msk.bf16.gmra.mrb[4].mxu1 %vm271_vm1, %v4273_v7 }
  0xde   : > { %3654 = vmatmul.mubr.msk.bf16.gmra.mrb[20].mxu0 %vm271_vm1, %v4191_v12  ;;  %3505 = vmatprep.mubr.msk.bf16.mxu1 %vm271_vm1, %v4293_v24 }
  0xdf   : > { %3657 = vmatprep.mubr.msk.bf16.mxu0 %vm271_vm1, %v4195_v14 }
  0xe5   : > { %3506 = vmatmul.mubr.msk.bf16.gmra.mrb[8].mxu1 %vm271_vm1, %v4297_v28 }
  0xe6   : > { %3658 = vmatmul.mubr.msk.bf16.gmra.mrb[24].mxu0 %vm271_vm1, %v4215_v29  ;;  %3509 = vmatprep.mubr.msk.bf16.mxu1 %vm271_vm1, %v4315_v43 }
  0xe7   : > { %3661 = vmatprep.mubr.msk.bf16.mxu0 %vm271_vm1, %v2215_v19 }
  0xed   : > { %3510 = vmatmul.mubr.msk.bf16.gmra.mrb[12].mxu1 %vm271_vm1, %v4319_v47 }
  0xee   : > { %3662 = vmatmul.mubr.msk.bf16.gmra.mrb[28].mxu0 %vm271_vm1, %v2216_v32  ;;  %3513 = vmatprep.mubr.msk.bf16.mxu1 %vm271_vm1, %v4333_v59 }
  0xef   : > { %3667 = vmatprep.mubr.msk.bf16.mxu0 %vm271_vm1, %v4137_v49 }
  0xf5   : > { %3514 = vmatmul.mubr.msk.bf16.gmra.mrb[16].mxu1 %vm271_vm1, %v4335_v60 }
  0xf6   : > { %3668 = vmatmul.mubr.msk.bf16.vlgmr.msra.gmra.mrb[0].mxu0 %vm271_vm1, %v4141_v51  ;;  %3517 = vmatprep.mubr.msk.bf16.mxu1 %vm271_vm1, %v4355_v17 }
  0xf7   : > { %3671 = vmatprep.mubr.msk.bf16.mxu0 %vm271_vm1, %v4169_v63 }
  0xfd   : > { %3518 = vmatmul.mubr.msk.bf16.gmra.mrb[20].mxu1 %vm271_vm1, %v4357_v18 }
  0xfe   : > { %3672 = vmatmul.mubr.msk.bf16.gmra.mrb[4].mxu0 %vm271_vm1, %v4173_v2  ;;  %3521 = vmatprep.mubr.msk.bf16.mxu1 %vm271_vm1, %v4371_v36 }
  0xff   : > { %3675 = vmatprep.mubr.msk.bf16.mxu0 %vm271_vm1, %v4193_v13 }
 0x105   : > { %3522 = vmatmul.mubr.msk.bf16.gmra.mrb[24].mxu1 %vm271_vm1, %v4373_v37 }
 0x106   : > { %3676 = vmatmul.mubr.msk.bf16.gmra.mrb[8].mxu0 %vm271_vm1, %v4197_v16  ;;  %3525 = vmatprep.mubr.msk.bf16.mxu1 %vm271_vm1, %v4387_v57 }
 0x107   : > { %3679 = vmatprep.mubr.msk.bf16.mxu0 %vm271_vm1, %v4217_v30 }
 0x10d   : > { %3526 = vmatmul.mubr.msk.bf16.gmra.mrb[28].mxu1 %vm271_vm1, %v4418_v61 }
 0x10e   : > { %3680 = vmatmul.mubr.msk.bf16.gmra.mrb[12].mxu0 %vm271_vm1, %v4219_v34  ;;  %3547 = vmatprep.mubr.msk.bf16.mxu1 %vm271_vm1, %v4135_v48  ;;  %v2510_v48 = vpack.c.bf16 %v3218_v38, %v3217_v33 }
 0x10f   : > { %3683 = vmatprep.mubr.msk.bf16.mxu0 %vm271_vm1, %v4238_v46 }
 0x115   : > { %3548 = vmatmul.mubr.msk.bf16.vlgmr.msra.gmra.mrb[16].mxu1 %vm271_vm1, %v4139_v50 }
 0x116   : > { %3684 = vmatmul.mubr.msk.bf16.gmra.mrb[16].mxu0 %vm271_vm1, %v4244_v54  ;;  %3551 = vmatprep.mubr.msk.bf16.mxu1 %vm271_vm1, %v4167_v62  ;;  %v4569_v54 = vld [vmem:[%s4677_s2] ss:$0 sm:$0xff] }
 0x117   : > { %3687 = vmatprep.mubr.msk.bf16.mxu0 %vm271_vm1, %v4271_v6 }
 0x11d   : > { %3552 = vmatmul.mubr.msk.bf16.gmra.mrb[20].mxu1 %vm271_vm1, %v4171_v0 }
 0x11e   : > { %3688 = vmatmul.mubr.msk.bf16.gmra.mrb[20].mxu0 %vm271_vm1, %v4275_v8  ;;  %3555 = vmatprep.mubr.msk.bf16.mxu1 %vm271_vm1, %v4191_v12 }
 0x11f   : > { %3691 = vmatprep.mubr.msk.bf16.mxu0 %vm271_vm1, %v4295_v25 }
 0x125   : > { %3556 = vmatmul.mubr.msk.bf16.gmra.mrb[24].mxu1 %vm271_vm1, %v4195_v14 }
 0x126   : > { %3692 = vmatmul.mubr.msk.bf16.gmra.mrb[24].mxu0 %vm271_vm1, %v4299_v31  ;;  %3559 = vmatprep.mubr.msk.bf16.mxu1 %vm271_vm1, %v4215_v29 }
 0x127   : > { %3695 = vmatprep.mubr.msk.bf16.mxu0 %vm271_vm1, %v4317_v44 }
 0x12d   : > { %3560 = vmatmul.mubr.msk.bf16.gmra.mrb[28].mxu1 %vm271_vm1, %v2215_v19 }
 0x12e   : > { %3696 = vmatmul.mubr.msk.bf16.gmra.mrb[28].mxu0 %vm271_vm1, %v2510_v48 }
 0x1a8   : > { %v3499_v49 = vpop.f32.mrb[0].mxu1 }
 0x1a9   : > { %v1127_v50 = vpop.f32.mrb[1].mxu1 }
 0x1aa   : > { %v3500_v51 = vpop.f32.mrb[2].mxu1 }
 0x1ab   : > { %v1130_v62 = vpop.f32.mrb[3].mxu1 }
 0x1b0   : > { %v3503_v63 = vpop.f32.mrb[4].mxu1 }
 0x1b1   : > { %v1143_v0 = vpop.f32.mrb[5].mxu1 }
 0x1b2   : > { %v3504_v2 = vpop.f32.mrb[6].mxu1 }
 0x1b3   : > { %v1146_v12 = vpop.f32.mrb[7].mxu1 }
 0x1b8   : > { %v3507_v13 = vpop.f32.mrb[8].mxu1 }
 0x1b9   : > { %v1159_v14 = vpop.f32.mrb[9].mxu1 }
 0x1ba   : > { %v3508_v16 = vpop.f32.mrb[10].mxu1 }
 0x1bb   : > { %v1162_v29 = vpop.f32.mrb[11].mxu1 }
 0x1c0   : > { %v3511_v30 = vpop.f32.mrb[12].mxu1 }
 0x1c1   : > { %v1175_v34 = vpop.f32.mrb[13].mxu1 }
 0x1c2   : > { %v3512_v45 = vpop.f32.mrb[14].mxu1 }
 0x1c3   : > { %v1178_v46 = vpop.f32.mrb[15].mxu1 }
 0x1c9   : > { %v3669_v52 = vpop.f32.mrb[0].mxu0 }
 0x1ca   : > { %v3701_v5 = vadd.f32 %v3669_v52, %v3499_v49  ;;  %v2598_v6 = vpop.f32.mrb[1].mxu0 }
 0x1cb   : > { %v3702_v7 = vadd.f32 %v2598_v6, %v1127_v50  ;;  %v3670_v8 = vpop.f32.mrb[2].mxu0 }
 0x1cc   : > { %v2766_v24 = vadd.f32 %v3701_v5, %v4569_v54  ;;  %v3703_v25 = vadd.f32 %v3670_v8, %v3500_v51  ;;  %v2601_v28 = vpop.f32.mrb[3].mxu0 }
 0x1cd   : > { %v2764_v31 = vadd.f32 %v3702_v7, %v4569_v54  ;;  %v3704_v43 = vadd.f32 %v2601_v28, %v1130_v62 }
 0x1ce   : > { %2799 = vst.msk [vmem:[%s4574_s16 + $0x10] sm:$0xff] %vm2796_vm2, %v2766_v24  ;;  %v2767_v44 = vadd.f32 %v3703_v25, %v4569_v54 }
 0x1cf   : > { %2797 = vst.msk [vmem:[%s4574_s16] sm:$0xff] %vm2796_vm2, %v2764_v31  ;;  %v2765_v47 = vadd.f32 %v3704_v43, %v4569_v54 }
 0x1d0   : > { %2800 = vst.msk [vmem:[%s4574_s16 + $0x18] sm:$0xff] %vm2796_vm2, %v2767_v44 }
 0x1d1   : > { %2798 = vst.msk [vmem:[%s4574_s16 + $0x8] sm:$0xff] %vm2796_vm2, %v2765_v47  ;;  %v3673_v59 = vpop.f32.mrb[4].mxu0 }
 0x1d2   : > { %v3705_v60 = vadd.f32 %v3673_v59, %v3503_v63  ;;  %v2614_v4 = vpop.f32.mrb[5].mxu0 }
 0x1d3   : > { %v3706_v11 = vadd.f32 %v2614_v4, %v1143_v0  ;;  %v3674_v17 = vpop.f32.mrb[6].mxu0 }
 0x1d4   : > { %v2770_v18 = vadd.f32 %v3705_v60, %v4569_v54  ;;  %v3707_v20 = vadd.f32 %v3674_v17, %v3504_v2  ;;  %v2617_v22 = vpop.f32.mrb[7].mxu0 }
 0x1d5   : > { %v2768_v23 = vadd.f32 %v3706_v11, %v4569_v54  ;;  %v3708_v35 = vadd.f32 %v2617_v22, %v1146_v12 }
 0x1d6   : > { %2803 = vst.msk [vmem:[%s4574_s16 + $0x30] sm:$0xff] %vm2796_vm2, %v2770_v18  ;;  %v2771_v36 = vadd.f32 %v3707_v20, %v4569_v54 }
 0x1d7   : > { %2801 = vst.msk [vmem:[%s4574_s16 + $0x20] sm:$0xff] %vm2796_vm2, %v2768_v23  ;;  %v2769_v37 = vadd.f32 %v3708_v35, %v4569_v54 }
 0x1d8   : > { %2804 = vst.msk [vmem:[%s4574_s16 + $0x38] sm:$0xff] %vm2796_vm2, %v2771_v36 }
 0x1d9   : > { %2802 = vst.msk [vmem:[%s4574_s16 + $0x28] sm:$0xff] %vm2796_vm2, %v2769_v37  ;;  %v3677_v40 = vpop.f32.mrb[8].mxu0 }
 0x1da   : > { %v3709_v41 = vadd.f32 %v3677_v40, %v3507_v13  ;;  %v2630_v42 = vpop.f32.mrb[9].mxu0 }
 0x1db   : > { %v3710_v56 = vadd.f32 %v2630_v42, %v1159_v14  ;;  %v3678_v57 = vpop.f32.mrb[10].mxu0 }
 0x1dc   : > { %v2774_v21 = vadd.f32 %v3709_v41, %v4569_v54  ;;  %v3711_v58 = vadd.f32 %v3678_v57, %v3508_v16  ;;  %v2633_v39 = vpop.f32.mrb[11].mxu0 }
 0x1dd   : > { %v2772_v55 = vadd.f32 %v3710_v56, %v4569_v54  ;;  %v3712_v61 = vadd.f32 %v2633_v39, %v1162_v29 }
 0x1de   : > { %2807 = vst.msk [vmem:[%s4574_s16 + $0x50] sm:$0xff] %vm2796_vm2, %v2774_v21  ;;  %v2775_v1 = vadd.f32 %v3711_v58, %v4569_v54 }
 0x1df   : > { %2805 = vst.msk [vmem:[%s4574_s16 + $0x40] sm:$0xff] %vm2796_vm2, %v2772_v55  ;;  %v2773_v9 = vadd.f32 %v3712_v61, %v4569_v54 }
 0x1e0   : > { %2808 = vst.msk [vmem:[%s4574_s16 + $0x58] sm:$0xff] %vm2796_vm2, %v2775_v1 }
 0x1e1   : > { %2806 = vst.msk [vmem:[%s4574_s16 + $0x48] sm:$0xff] %vm2796_vm2, %v2773_v9  ;;  %v3681_v10 = vpop.f32.mrb[12].mxu0 }
 0x1e2   : > { %v3713_v53 = vadd.f32 %v3681_v10, %v3511_v30  ;;  %v2646_v3 = vpop.f32.mrb[13].mxu0 }
 0x1e3   : > { %v3714_v15 = vadd.f32 %v2646_v3, %v1175_v34  ;;  %v3682_v19 = vpop.f32.mrb[14].mxu0 }
 0x1e4   : > { %v2778_v26 = vadd.f32 %v3713_v53, %v4569_v54  ;;  %v3715_v27 = vadd.f32 %v3682_v19, %v3512_v45  ;;  %v2649_v32 = vpop.f32.mrb[15].mxu0 }
 0x1e5   : > { %v2776_v33 = vadd.f32 %v3714_v15, %v4569_v54  ;;  %v3716_v38 = vadd.f32 %v2649_v32, %v1178_v46 }
 0x1e6   : > { %2811 = vst.msk [vmem:[%s4574_s16 + $0x70] sm:$0xff] %vm2796_vm2, %v2778_v26  ;;  %v2779_v48 = vadd.f32 %v3715_v27, %v4569_v54 }
 0x1e7   : > { %2809 = vst.msk [vmem:[%s4574_s16 + $0x60] sm:$0xff] %vm2796_vm2, %v2776_v33  ;;  %v2777_v49 = vadd.f32 %v3716_v38, %v4569_v54 }
 0x1e8   : > { %2812 = vst.msk [vmem:[%s4574_s16 + $0x78] sm:$0xff] %vm2796_vm2, %v2779_v48  ;;  %v3549_v50 = vpop.f32.mrb[16].mxu1 }
 0x1e9   : > { %2810 = vst.msk [vmem:[%s4574_s16 + $0x68] sm:$0xff] %vm2796_vm2, %v2777_v49  ;;  %v3685_v51 = vpop.f32.mrb[16].mxu0  ;;  %v1485_v62 = vpop.f32.mrb[17].mxu1 }
 0x1ea   : > { %v3717_v63 = vadd.f32 %v3685_v51, %v3549_v50  ;;  %v2662_v0 = vpop.f32.mrb[17].mxu0  ;;  %v3550_v2 = vpop.f32.mrb[18].mxu1 }
 0x1eb   : > { %v3718_v12 = vadd.f32 %v2662_v0, %v1485_v62  ;;  %v3686_v13 = vpop.f32.mrb[18].mxu0  ;;  %v1488_v14 = vpop.f32.mrb[19].mxu1 }
 0x1ec   : > { %v2782_v16 = vadd.f32 %v3717_v63, %v4569_v54  ;;  %v3719_v29 = vadd.f32 %v3686_v13, %v3550_v2  ;;  %v2665_v30 = vpop.f32.mrb[19].mxu0 }
 0x1ed   : > { %v2780_v34 = vadd.f32 %v3718_v12, %v4569_v54  ;;  %v3720_v45 = vadd.f32 %v2665_v30, %v1488_v14 }
 0x1ee   : > { %2815 = vst.msk [vmem:[%s4574_s16 + $0x90] sm:$0xff] %vm2796_vm2, %v2782_v16  ;;  %v2783_v46 = vadd.f32 %v3719_v29, %v4569_v54 }
 0x1ef   : > { %2813 = vst.msk [vmem:[%s4574_s16 + $0x80] sm:$0xff] %vm2796_vm2, %v2780_v34  ;;  %v2781_v52 = vadd.f32 %v3720_v45, %v4569_v54 }
 0x1f0   : > { %2816 = vst.msk [vmem:[%s4574_s16 + $0x98] sm:$0xff] %vm2796_vm2, %v2783_v46  ;;  %v3553_v5 = vpop.f32.mrb[20].mxu1 }
 0x1f1   : > { %2814 = vst.msk [vmem:[%s4574_s16 + $0x88] sm:$0xff] %vm2796_vm2, %v2781_v52  ;;  %v3689_v6 = vpop.f32.mrb[20].mxu0  ;;  %v1501_v7 = vpop.f32.mrb[21].mxu1 }
 0x1f2   : > { %v3721_v8 = vadd.f32 %v3689_v6, %v3553_v5  ;;  %v2678_v24 = vpop.f32.mrb[21].mxu0  ;;  %v3554_v25 = vpop.f32.mrb[22].mxu1 }
 0x1f3   : > { %v3722_v28 = vadd.f32 %v2678_v24, %v1501_v7  ;;  %v3690_v31 = vpop.f32.mrb[22].mxu0  ;;  %v1504_v43 = vpop.f32.mrb[23].mxu1 }
 0x1f4   : > { %v2786_v44 = vadd.f32 %v3721_v8, %v4569_v54  ;;  %v3723_v47 = vadd.f32 %v3690_v31, %v3554_v25  ;;  %v2681_v59 = vpop.f32.mrb[23].mxu0 }
 0x1f5   : > { %v2784_v60 = vadd.f32 %v3722_v28, %v4569_v54  ;;  %v3724_v4 = vadd.f32 %v2681_v59, %v1504_v43 }
 0x1f6   : > { %2819 = vst.msk [vmem:[%s4574_s16 + $0xb0] sm:$0xff] %vm2796_vm2, %v2786_v44  ;;  %v2787_v11 = vadd.f32 %v3723_v47, %v4569_v54 }
 0x1f7   : > { %2817 = vst.msk [vmem:[%s4574_s16 + $0xa0] sm:$0xff] %vm2796_vm2, %v2784_v60  ;;  %v2785_v17 = vadd.f32 %v3724_v4, %v4569_v54 }
 0x1f8   : > { %2820 = vst.msk [vmem:[%s4574_s16 + $0xb8] sm:$0xff] %vm2796_vm2, %v2787_v11  ;;  %v3557_v18 = vpop.f32.mrb[24].mxu1 }
 0x1f9   : > { %2818 = vst.msk [vmem:[%s4574_s16 + $0xa8] sm:$0xff] %vm2796_vm2, %v2785_v17  ;;  %v3693_v20 = vpop.f32.mrb[24].mxu0  ;;  %v1517_v22 = vpop.f32.mrb[25].mxu1 }
 0x1fa   : > { %v3725_v23 = vadd.f32 %v3693_v20, %v3557_v18  ;;  %v2694_v35 = vpop.f32.mrb[25].mxu0  ;;  %v3558_v36 = vpop.f32.mrb[26].mxu1 }
 0x1fb   : > { %v3726_v37 = vadd.f32 %v2694_v35, %v1517_v22  ;;  %v3694_v40 = vpop.f32.mrb[26].mxu0  ;;  %v1520_v41 = vpop.f32.mrb[27].mxu1 }
 0x1fc   : > { %v2790_v42 = vadd.f32 %v3725_v23, %v4569_v54  ;;  %v3727_v56 = vadd.f32 %v3694_v40, %v3558_v36  ;;  %v2697_v57 = vpop.f32.mrb[27].mxu0 }
 0x1fd   : > { %v2788_v21 = vadd.f32 %v3726_v37, %v4569_v54  ;;  %v3728_v58 = vadd.f32 %v2697_v57, %v1520_v41 }
 0x1fe   : > { %2823 = vst.msk [vmem:[%s4574_s16 + $0xd0] sm:$0xff] %vm2796_vm2, %v2790_v42  ;;  %v2791_v39 = vadd.f32 %v3727_v56, %v4569_v54 }
 0x1ff   : > { %2821 = vst.msk [vmem:[%s4574_s16 + $0xc0] sm:$0xff] %vm2796_vm2, %v2788_v21  ;;  %v2789_v55 = vadd.f32 %v3728_v58, %v4569_v54 }
 0x200   : > { %2824 = vst.msk [vmem:[%s4574_s16 + $0xd8] sm:$0xff] %vm2796_vm2, %v2791_v39  ;;  %v3561_v61 = vpop.f32.mrb[28].mxu1 }
 0x201   : > { %2822 = vst.msk [vmem:[%s4574_s16 + $0xc8] sm:$0xff] %vm2796_vm2, %v2789_v55  ;;  %v3697_v1 = vpop.f32.mrb[28].mxu0  ;;  %v1533_v9 = vpop.f32.mrb[29].mxu1 }
 0x202   : > { %v3729_v10 = vadd.f32 %v3697_v1, %v3561_v61  ;;  %v2710_v53 = vpop.f32.mrb[29].mxu0  ;;  %v3562_v3 = vpop.f32.mrb[30].mxu1 }
 0x203   : > { %v3730_v15 = vadd.f32 %v2710_v53, %v1533_v9  ;;  %v3698_v19 = vpop.f32.mrb[30].mxu0  ;;  %v1536_v26 = vpop.f32.mrb[31].mxu1 }
 0x204   : > { %v2794_v27 = vadd.f32 %v3729_v10, %v4569_v54  ;;  %v3731_v32 = vadd.f32 %v3698_v19, %v3562_v3  ;;  %v2713_v33 = vpop.f32.mrb[31].mxu0 }
 0x205   : > { %v2792_v38 = vadd.f32 %v3730_v15, %v4569_v54  ;;  %v3732_v48 = vadd.f32 %v2713_v33, %v1536_v26 }
 0x206   : > { %2827 = vst.msk [vmem:[%s4574_s16 + $0xf0] sm:$0xff] %vm2796_vm2, %v2794_v27  ;;  %v2795_v49 = vadd.f32 %v3731_v32, %v4569_v54 }
 0x207   : > { %2825 = vst.msk [vmem:[%s4574_s16 + $0xe0] sm:$0xff] %vm2796_vm2, %v2792_v38  ;;  %v2793_v50 = vadd.f32 %v3732_v48, %v4569_v54 }
 0x208   : > { %2828 = vst.msk [vmem:[%s4574_s16 + $0xf8] sm:$0xff] %vm2796_vm2, %v2795_v49 }
 0x209   : > { %2826 = vst.msk [vmem:[%s4574_s16 + $0xe8] sm:$0xff] %vm2796_vm2, %v2793_v50 }
 0x20a PF: > { %s13_s12 = sadd.s32 1, %s3982_s12  }
 0x20b   : > { %p10_p4 = scmp.ge.s32.totalorder %s13_s12, 4  }
 0x20d   :  { %12 = sbr.rel (!%p10_p4) target bundleno = 1 (0x1), region = 72 }

</bundles_post_ra>
